<compile_context>
chip_gen: v5e
topology: v5e:2x2
jax: 0.10.0
libtpu: 0.0.40
codegen_flags: <defaults>
</compile_context>

<pallas_src>
import jax
import jax.numpy as jnp
from jax import lax
from jax.experimental import pallas as pl
from jax.experimental.pallas import tpu as pltpu


# Contract lhs dim 1 with rhs dim 1 (i.e. A @ B^T) -- same pattern as the TPU
# flash-attention kernel's NT_DIM_NUMBERS, natively supported by the MXU path.
_NT_DIMS = (((1,), (1,)), ((), ()))


def _classify_kernel(x_ref, w1_ref, b1_ref, w2_ref, b2_ref,
                     w3_ref, b3_ref, w4_ref, b4_ref, o_ref):
    # x tile: (TB, in)  -- streamed per grid step (batch rows).
    # weights: nn.Linear layout (out, in); biases: (out, 1).
    # Activations are feature-major (features, TB): lane-dense for small H and
    # the final logits come out natively as (1, TB) -> no epilogue transpose.
    x = x_ref[...]

    # layer1 + ReLU: (H, in) x (TB, in)^T -> (H, TB)
    h = lax.dot_general(w1_ref[...], x, _NT_DIMS,
                        preferred_element_type=jnp.float32)
    h = jnp.maximum(h + b1_ref[...], 0.0)

    # layer2 + ReLU: (H, H) x (H, TB) -> (H, TB)
    h = jnp.dot(w2_ref[...], h, preferred_element_type=jnp.float32)
    h = jnp.maximum(h + b2_ref[...], 0.0)

    # layer3 + ReLU
    h = jnp.dot(w3_ref[...], h, preferred_element_type=jnp.float32)
    h = jnp.maximum(h + b3_ref[...], 0.0)

    # output layer + exact sigmoid: (1, H) x (H, TB) -> (1, TB)
    logit = jnp.dot(w4_ref[...], h, preferred_element_type=jnp.float32) + b4_ref[...]
    o_ref[...] = (1.0 / (1.0 + jnp.exp(-logit))).astype(o_ref.dtype)


def _round_up(n, m):
    return ((n + m - 1) // m) * m


def _vmem_limit_bytes():
    # Generation-aware VMEM budget (v7x: 64 MiB physical vs 128 MiB on v5e/v6e).
    try:
        cap = int(getattr(pltpu.get_tpu_info(), "vmem_capacity_bytes", 64 << 20))
    except Exception:  # pragma: no cover - conservative fallback off-device
        cap = 64 << 20
    return min(cap * 3 // 4, 96 << 20)


def _padded_tile_bytes(rows, cols, dtype_bytes=4):
    # f32 VMEM footprint of a 2-D tile after (8, 128) layout padding.
    return dtype_bytes * _round_up(rows, 8) * _round_up(cols, 128)


def _pick_batch_tile(B, in_size, H, vmem_limit, max_batch_tile=None):
    """Pad batch only to a multiple of 128 and pick the largest VMEM-fitting TB
    (a multiple of 128) that divides the padded batch -> no tile-sized padding
    waste and as few ~0.35us grid steps as the budget allows."""
    Bp = _round_up(max(B, 1), 128)

    # Grid-invariant VMEM: weights + biases (x2 for the default double-buffering).
    fixed = 2 * sum(_padded_tile_bytes(r, c) for (r, c) in
                    [(H, in_size), (H, 1), (H, H), (H, 1),
                     (H, H), (H, 1), (1, H), (1, 1)])
    # Per-batch-row VMEM: x double-buffered (lane-padded) + ~4 live (H, TB) f32
    # intermediates + the (1, TB) output double-buffered (sublane-padded to 8).
    per_row = 4 * (2 * _round_up(in_size, 128) + 4 * _round_up(H, 8) + 2 * 8)
    headroom = 2 << 20
    budget_rows = (vmem_limit - fixed - headroom) // per_row
    tb_cap = max(128, min((int(budget_rows) // 128) * 128, 4096))
    if max_batch_tile is not None:
        tb_cap = max(128, min(tb_cap, (int(max_batch_tile) // 128) * 128))

    nblk = Bp // 128
    cands = [128 * d for d in range(1, nblk + 1)
             if nblk % d == 0 and 128 * d <= tb_cap]
    TB = max(cands) if cands else 128
    return TB, Bp


def classify_forward(x, params, *, max_batch_tile=None):
    """x: (B, in_size) float32.  params: nn.Linear layout weights (out, in),
    biases (out, 1).  Returns (B, 1) sigmoid outputs."""
    B, in_size = x.shape
    H = params["w1"].shape[0]

    vmem_limit = _vmem_limit_bytes()
    TB, Bp = _pick_batch_tile(B, in_size, H, vmem_limit, max_batch_tile)
    if Bp != B:
        x = jnp.pad(x, ((0, Bp - B), (0, 0)))   # zero rows -> finite sigmoid, sliced away
    grid = (Bp // TB,)

    w1, b1, w2, b2, w3, b3, w4, b4 = (
        params["w1"], params["b1"], params["w2"], params["b2"],
        params["w3"], params["b3"], params["w4"], params["b4"],
    )

    # Weights/biases: constant block index every grid step -> stay VMEM-resident.
    def resident(a):
        return pl.BlockSpec(a.shape, lambda i: (0,) * a.ndim)

    flops = 2 * Bp * (in_size * H + 2 * H * H + H)
    bytes_accessed = 4 * (Bp * in_size + H * in_size + 2 * H * H + 4 * H + 1 + Bp)

    out_t = pl.pallas_call(
        _classify_kernel,
        out_shape=jax.ShapeDtypeStruct((1, Bp), jnp.float32),
        grid=grid,
        in_specs=[
            pl.BlockSpec((TB, in_size), lambda i: (i, 0)),
            resident(w1), resident(b1),
            resident(w2), resident(b2),
            resident(w3), resident(b3),
            resident(w4), resident(b4),
        ],
        # Lane-dense output: batch on the lane axis, no masked partial stores.
        out_specs=pl.BlockSpec((1, TB), lambda i: (0, i)),
        compiler_params=pltpu.CompilerParams(
            dimension_semantics=("parallel",),
            vmem_limit_bytes=vmem_limit,
        ),
        cost_estimate=pl.CostEstimate(
            flops=flops, transcendentals=Bp, bytes_accessed=bytes_accessed),
    )(x, w1, b1, w2, b2, w3, b3, w4, b4)

    # (1, Bp) lane-dense result -> (B, 1)
    return out_t[0, :B].reshape(B, 1)


def init_params(key, in_size, hidden_size):
    """Deterministic init matching nn.Linear shapes: W (out, in), b (out, 1)."""
    ks = jax.random.split(key, 8)

    def lin(kw, kb, fan_in, fan_out):
        bound = 1.0 / jnp.sqrt(fan_in)
        w = jax.random.uniform(kw, (fan_out, fan_in), jnp.float32, -bound, bound)
        b = jax.random.uniform(kb, (fan_out, 1), jnp.float32, -bound, bound)
        return w, b

    w1, b1 = lin(ks[0], ks[1], in_size, hidden_size)
    w2, b2 = lin(ks[2], ks[3], hidden_size, hidden_size)
    w3, b3 = lin(ks[4], ks[5], hidden_size, hidden_size)
    w4, b4 = lin(ks[6], ks[7], hidden_size, 1)
    return dict(w1=w1, b1=b1, w2=w2, b2=b2, w3=w3, b3=b3, w4=w4, b4=b4)


def classify_ref(x, p):
    # Pure-JAX reference in nn.Linear convention: y = x @ W.T + b.
    with jax.default_matmul_precision("highest"):
        h = jnp.maximum(x @ p["w1"].T + p["b1"].T, 0.0)
        h = jnp.maximum(h @ p["w2"].T + p["b2"].T, 0.0)
        h = jnp.maximum(h @ p["w3"].T + p["b3"].T, 0.0)
        return jax.nn.sigmoid(h @ p["w4"].T + p["b4"].T)


if __name__ == "__main__":
    key = jax.random.PRNGKey(0)
    kx1, kx2, kp = jax.random.split(key, 3)
    in_size, hidden_size = 32, 32
    params = init_params(kp, in_size, hidden_size)

    # Small batch: single grid tile, padded to 128 rows.
    B1 = 8
    x1 = jax.random.normal(kx1, (B1, in_size), jnp.float32)
    out1 = jax.block_until_ready(classify_forward(x1, params))
    ref1 = classify_ref(x1, params)
    assert out1.shape == (B1, 1), out1.shape
    assert jnp.allclose(out1, ref1, atol=2e-3, rtol=2e-3), (out1, ref1)

    # Non-aligned batch, adaptive tile (260 -> 384 padded rows, single step).
    B2 = 260
    x2 = jax.random.normal(kx2, (B2, in_size), jnp.float32)
    out2 = jax.block_until_ready(classify_forward(x2, params))
    ref2 = classify_ref(x2, params)
    assert out2.shape == (B2, 1), out2.shape
    assert jnp.allclose(out2, ref2, atol=2e-3, rtol=2e-3), (out2, ref2)

    # Same batch, forced small tile: multi-step grid with VMEM-resident weights.
    out3 = jax.block_until_ready(classify_forward(x2, params, max_batch_tile=128))
    assert out3.shape == (B2, 1), out3.shape
    assert jnp.allclose(out3, ref2, atol=2e-3, rtol=2e-3), (out3, ref2)

    print("KERNEL_OK")
</pallas_src>

<mosaic_0001>
module attributes {stable_mosaic.version = 11 : i64} {
  func.func @_classify_kernel(%arg0: i32, %arg1: memref<128x32xf32, #tpu.memory_space<vmem>>, %arg2: memref<32x32xf32, #tpu.memory_space<vmem>>, %arg3: memref<32x1xf32, #tpu.memory_space<vmem>>, %arg4: memref<32x32xf32, #tpu.memory_space<vmem>>, %arg5: memref<32x1xf32, #tpu.memory_space<vmem>>, %arg6: memref<32x32xf32, #tpu.memory_space<vmem>>, %arg7: memref<32x1xf32, #tpu.memory_space<vmem>>, %arg8: memref<1x32xf32, #tpu.memory_space<vmem>>, %arg9: memref<1x1xf32, #tpu.memory_space<vmem>>, %arg10: memref<1x128xf32, #tpu.memory_space<vmem>>) attributes {dimension_semantics = [#tpu.dimension_semantics<parallel>], iteration_bounds = array<i64: 1>, scalar_prefetch = 0 : i64, scratch_operands = 0 : i64, tpu.core_type = #tpu.core_type<tc>, window_params = [{transform_indices = @transform_0, window_bounds = array<i64: 128, 32>}, {pipeline_mode = #tpu.pipeline_mode<synchronous>, transform_indices = @transform_1, window_bounds = array<i64: 32, 32>}, {pipeline_mode = #tpu.pipeline_mode<synchronous>, transform_indices = @transform_2, window_bounds = array<i64: 32, 1>}, {pipeline_mode = #tpu.pipeline_mode<synchronous>, transform_indices = @transform_3, window_bounds = array<i64: 32, 32>}, {pipeline_mode = #tpu.pipeline_mode<synchronous>, transform_indices = @transform_4, window_bounds = array<i64: 32, 1>}, {pipeline_mode = #tpu.pipeline_mode<synchronous>, transform_indices = @transform_5, window_bounds = array<i64: 32, 32>}, {pipeline_mode = #tpu.pipeline_mode<synchronous>, transform_indices = @transform_6, window_bounds = array<i64: 32, 1>}, {pipeline_mode = #tpu.pipeline_mode<synchronous>, transform_indices = @transform_7, window_bounds = array<i64: 1, 32>}, {pipeline_mode = #tpu.pipeline_mode<synchronous>, transform_indices = @transform_8, window_bounds = array<i64: 1, 1>}, {transform_indices = @transform_9, window_bounds = array<i64: 1, 128>}]} {
    %c0 = arith.constant 0 : index
    %c0_0 = arith.constant 0 : index
    %0 = vector.load %arg1[%c0, %c0_0] : memref<128x32xf32, #tpu.memory_space<vmem>>, vector<128x32xf32>
    %c0_1 = arith.constant 0 : index
    %c0_2 = arith.constant 0 : index
    %1 = vector.load %arg2[%c0_1, %c0_2] : memref<32x32xf32, #tpu.memory_space<vmem>>, vector<32x32xf32>
    %cst = arith.constant dense<0.000000e+00> : vector<32x128xf32>
    %2 = tpu.matmul %1, %0, %cst {dimension_numbers = #tpu.dot_dimension_numbers<[1], [1], [0], [0], [0, 0, 1, 0], [], []>} : vector<32x32xf32>, vector<128x32xf32>, vector<32x128xf32> -> vector<32x128xf32>
    %c0_3 = arith.constant 0 : index
    %c0_4 = arith.constant 0 : index
    %3 = vector.load %arg3[%c0_3, %c0_4] : memref<32x1xf32, #tpu.memory_space<vmem>>, vector<32x1xf32>
    %4 = vector.broadcast %3 : vector<32x1xf32> to vector<32x128xf32>
    %5 = arith.addf %2, %4 : vector<32x128xf32>
    %cst_5 = arith.constant 0.000000e+00 : f32
    %6 = vector.broadcast %cst_5 : f32 to vector<32x128xf32>
    %7 = arith.maximumf %5, %6 : vector<32x128xf32>
    %c0_6 = arith.constant 0 : index
    %c0_7 = arith.constant 0 : index
    %8 = vector.load %arg4[%c0_6, %c0_7] : memref<32x32xf32, #tpu.memory_space<vmem>>, vector<32x32xf32>
    %cst_8 = arith.constant dense<0.000000e+00> : vector<32x128xf32>
    %9 = tpu.matmul %8, %7, %cst_8 {dimension_numbers = #tpu.dot_dimension_numbers<[1], [0], [0], [1], [0, 0, 1, 1], [], []>} : vector<32x32xf32>, vector<32x128xf32>, vector<32x128xf32> -> vector<32x128xf32>
    %c0_9 = arith.constant 0 : index
    %c0_10 = arith.constant 0 : index
    %10 = vector.load %arg5[%c0_9, %c0_10] : memref<32x1xf32, #tpu.memory_space<vmem>>, vector<32x1xf32>
    %11 = vector.broadcast %10 : vector<32x1xf32> to vector<32x128xf32>
    %12 = arith.addf %9, %11 : vector<32x128xf32>
    %cst_11 = arith.constant 0.000000e+00 : f32
    %13 = vector.broadcast %cst_11 : f32 to vector<32x128xf32>
    %14 = arith.maximumf %12, %13 : vector<32x128xf32>
    %c0_12 = arith.constant 0 : index
    %c0_13 = arith.constant 0 : index
    %15 = vector.load %arg6[%c0_12, %c0_13] : memref<32x32xf32, #tpu.memory_space<vmem>>, vector<32x32xf32>
    %cst_14 = arith.constant dense<0.000000e+00> : vector<32x128xf32>
    %16 = tpu.matmul %15, %14, %cst_14 {dimension_numbers = #tpu.dot_dimension_numbers<[1], [0], [0], [1], [0, 0, 1, 1], [], []>} : vector<32x32xf32>, vector<32x128xf32>, vector<32x128xf32> -> vector<32x128xf32>
    %c0_15 = arith.constant 0 : index
    %c0_16 = arith.constant 0 : index
    %17 = vector.load %arg7[%c0_15, %c0_16] : memref<32x1xf32, #tpu.memory_space<vmem>>, vector<32x1xf32>
    %18 = vector.broadcast %17 : vector<32x1xf32> to vector<32x128xf32>
    %19 = arith.addf %16, %18 : vector<32x128xf32>
    %cst_17 = arith.constant 0.000000e+00 : f32
    %20 = vector.broadcast %cst_17 : f32 to vector<32x128xf32>
    %21 = arith.maximumf %19, %20 : vector<32x128xf32>
    %c0_18 = arith.constant 0 : index
    %c0_19 = arith.constant 0 : index
    %22 = vector.load %arg8[%c0_18, %c0_19] : memref<1x32xf32, #tpu.memory_space<vmem>>, vector<1x32xf32>
    %cst_20 = arith.constant dense<0.000000e+00> : vector<1x128xf32>
    %23 = tpu.matmul %22, %21, %cst_20 {dimension_numbers = #tpu.dot_dimension_numbers<[1], [0], [0], [1], [0, 0, 1, 1], [], []>} : vector<1x32xf32>, vector<32x128xf32>, vector<1x128xf32> -> vector<1x128xf32>
    %c0_21 = arith.constant 0 : index
    %c0_22 = arith.constant 0 : index
    %24 = vector.load %arg9[%c0_21, %c0_22] : memref<1x1xf32, #tpu.memory_space<vmem>>, vector<1x1xf32>
    %25 = vector.broadcast %24 : vector<1x1xf32> to vector<1x128xf32>
    %26 = arith.addf %23, %25 : vector<1x128xf32>
    %cst_23 = arith.constant 0.000000e+00 : f32
    %27 = vector.broadcast %cst_23 : f32 to vector<1x128xf32>
    %28 = arith.subf %27, %26 : vector<1x128xf32>
    %29 = math.exp %28 : vector<1x128xf32>
    %cst_24 = arith.constant 1.000000e+00 : f32
    %30 = vector.broadcast %cst_24 : f32 to vector<1x128xf32>
    %31 = arith.addf %30, %29 : vector<1x128xf32>
    %cst_25 = arith.constant 1.000000e+00 : f32
    %32 = vector.broadcast %cst_25 : f32 to vector<1x128xf32>
    %33 = arith.divf %32, %31 : vector<1x128xf32>
    %c0_26 = arith.constant 0 : index
    %c0_27 = arith.constant 0 : index
    %34 = vector.load %arg10[%c0_26, %c0_27] : memref<1x128xf32, #tpu.memory_space<vmem>>, vector<1x128xf32>
    tpu.vector_store %arg10[%c0_26, %c0_27], %33 {strides = array<i32>} : memref<1x128xf32, #tpu.memory_space<vmem>>, vector<1x128xf32>,
    return
  }
  func.func @transform_0(%arg0: i32) -> (i32, i32) {
    %c0_i32 = arith.constant 0 : i32
    %c0_i32_0 = arith.constant 0 : i32
    return %arg0, %c0_i32 : i32, i32
  }
  func.func @transform_1(%arg0: i32) -> (i32, i32) {
    %c0_i32 = arith.constant 0 : i32
    %c0_i32_0 = arith.constant 0 : i32
    %c0_i32_1 = arith.constant 0 : i32
    return %c0_i32, %c0_i32_0 : i32, i32
  }
  func.func @transform_2(%arg0: i32) -> (i32, i32) {
    %c0_i32 = arith.constant 0 : i32
    %c0_i32_0 = arith.constant 0 : i32
    %c0_i32_1 = arith.constant 0 : i32
    return %c0_i32, %c0_i32_0 : i32, i32
  }
  func.func @transform_3(%arg0: i32) -> (i32, i32) {
    %c0_i32 = arith.constant 0 : i32
    %c0_i32_0 = arith.constant 0 : i32
    %c0_i32_1 = arith.constant 0 : i32
    return %c0_i32, %c0_i32_0 : i32, i32
  }
  func.func @transform_4(%arg0: i32) -> (i32, i32) {
    %c0_i32 = arith.constant 0 : i32
    %c0_i32_0 = arith.constant 0 : i32
    %c0_i32_1 = arith.constant 0 : i32
    return %c0_i32, %c0_i32_0 : i32, i32
  }
  func.func @transform_5(%arg0: i32) -> (i32, i32) {
    %c0_i32 = arith.constant 0 : i32
    %c0_i32_0 = arith.constant 0 : i32
    %c0_i32_1 = arith.constant 0 : i32
    return %c0_i32, %c0_i32_0 : i32, i32
  }
  func.func @transform_6(%arg0: i32) -> (i32, i32) {
    %c0_i32 = arith.constant 0 : i32
    %c0_i32_0 = arith.constant 0 : i32
    %c0_i32_1 = arith.constant 0 : i32
    return %c0_i32, %c0_i32_0 : i32, i32
  }
  func.func @transform_7(%arg0: i32) -> (i32, i32) {
    %c0_i32 = arith.constant 0 : i32
    %c0_i32_0 = arith.constant 0 : i32
    %c0_i32_1 = arith.constant 0 : i32
    return %c0_i32, %c0_i32_0 : i32, i32
  }
  func.func @transform_8(%arg0: i32) -> (i32, i32) {
    %c0_i32 = arith.constant 0 : i32
    %c0_i32_0 = arith.constant 0 : i32
    %c0_i32_1 = arith.constant 0 : i32
    return %c0_i32, %c0_i32_0 : i32, i32
  }
  func.func @transform_9(%arg0: i32) -> (i32, i32) {
    %c0_i32 = arith.constant 0 : i32
    %c0_i32_0 = arith.constant 0 : i32
    return %c0_i32, %arg0 : i32, i32
  }
}

</mosaic_0001>

<bundles_post_ra>
// kernel: tpu_custom_call.1
= control target key start
LH: loop header
LB: loop body
LE: loop exit
PB: predicated region body
PF: predicated region fallthrough
CT: control target
= control target key end

     0   :  { %s660_s0 = inlined_call_operand.vmem [shape: f32[128,32], index: 0, kind: input, shape index: {}]   ;;  %s661_s1 = inlined_call_operand.vmem [shape: f32[32,32], index: 1, kind: input, shape index: {}]   ;;  %s662_s2 = inlined_call_operand.vmem [shape: f32[32,1], index: 2, kind: input, shape index: {}]   ;;  %s663_s3 = inlined_call_operand.vmem [shape: f32[32,32], index: 3, kind: input, shape index: {}]   ;;  %s664_s4 = inlined_call_operand.vmem [shape: f32[32,1], index: 4, kind: input, shape index: {}]   ;;  %s665_s5 = inlined_call_operand.vmem [shape: f32[32,32], index: 5, kind: input, shape index: {}]   ;;  %s666_s6 = inlined_call_operand.vmem [shape: f32[32,1], index: 6, kind: input, shape index: {}]   ;;  %s667_s7 = inlined_call_operand.vmem [shape: f32[1,32], index: 7, kind: input, shape index: {}]   ;;  %s668_s8 = inlined_call_operand.<no memory space> [shape: f32[1,1], index: 8, kind: input, shape index: {}]   ;;  %s669_s9 = inlined_call_operand.hbm [shape: f32[1,128], index: 9, kind: output, shape index: {}]  }
   0x1   :  { %v14_v0 = vstv %s668_s8 }
   0x2   :  { %15 = vst [vmem:[#allocation2] sm:$0x1] %v14_v0 }
   0x3   :  { %v50_v1 = vld [vmem:[%s660_s0 + $0x78] sm:$0xff]  ;;  %vm79_vm0 = vcmask 261120   ;;  %v49_v2 = vld [vmem:[%s660_s0 + $0x70] sm:$0xff] }
   0x4   :  { %386 = vmatpush.xpose.msk.msra.mxu0 %vm79_vm0, %v50_v1 }
   0x5   :  { %16 = vsyncpa [#allocation4], 0  ;;  %v48_v3 = vld [vmem:[%s660_s0 + $0x68] sm:$0xff]  ;;  %v47_v4 = vld [vmem:[%s660_s0 + $0x60] sm:$0xff]  ;;  %v450_v10 = vmov 0   ;;  %s377_s20 = sshll.u32 %s669_s9, 4  ;;  %s378_s20 = int_to_ptr.hbm [resolvable:$true] %s377_s20 }
   0x6   :  { %v46_v5 = vld [vmem:[%s660_s0 + $0x58] sm:$0xff]  ;;  %v45_v6 = vld [vmem:[%s660_s0 + $0x50] sm:$0xff]  ;;  %v44_v7 = vld [vmem:[%s660_s0 + $0x48] sm:$0xff]  ;;  %417 = vset.pattern.permute.xlu0 %v450_v10  ;;  %418 = vset.pattern.permute.xlu1 %v450_v10 }
   0x7   :  { %v58_v8 = vld [vmem:[%s662_s2 + $0x18] sm:$0xff]  ;;  %v43_v9 = vld [vmem:[%s660_s0 + $0x40] sm:$0xff]  ;;  %419 = vset.pattern.permute.xlu2 %v450_v10  ;;  %v56_v12 = vld [vmem:[%s662_s2 + $0x8] sm:$0xff] }
   0x8   :  { %387 = vmatpush.xpose.msk.msra.mxu0 %vm79_vm0, %v49_v2  ;;  %76 = vperm.xlu0 %417, %v58_v8   ;;  %v42_v11 = vld [vmem:[%s660_s0 + $0x38] sm:$0xff]  ;;  %v57_v13 = vld [vmem:[%s662_s2 + $0x10] sm:$0xff]  ;;  %v40_v15 = vld [vmem:[%s660_s0 + $0x28] sm:$0xff] }
   0x9   :  { %66 = vperm.xlu1 %418, %v56_v12   ;;  %v41_v14 = vld [vmem:[%s660_s0 + $0x30] sm:$0xff]  ;;  %v55_v16 = vld [vmem:[%s662_s2] sm:$0xff]  ;;  %v178_v17 = vld [vmem:[%s664_s4 + $0x8] sm:$0xff] }
   0xa   :  { %v39_v18 = vld [vmem:[%s660_s0 + $0x20] sm:$0xff]  ;;  %v38_v19 = vld [vmem:[%s660_s0 + $0x18] sm:$0xff]  ;;  %v252_v20 = vld [vmem:[%s666_s6 + $0x10] sm:$0xff] }
   0xb   :  { %v37_v21 = vld [vmem:[%s660_s0 + $0x10] sm:$0xff]  ;;  %v36_v22 = vld [vmem:[%s660_s0 + $0x8] sm:$0xff]  ;;  %v177_v23 = vld [vmem:[%s664_s4] sm:$0xff] }
   0xc   :  { %388 = vmatpush.xpose.msk.msra.mxu0 %vm79_vm0, %v48_v3  ;;  %v320_v24 = vld [vmem:[#allocation2] sm:$0x1]  ;;  %v251_v27 = vld [vmem:[%s666_s6 + $0x8] sm:$0xff]  ;;  %v53_v29 = vld [vmem:[%s661_s1 + $0x10] sm:$0xff] }
   0xd   :  { %v35_v25 = vld [vmem:[%s660_s0] sm:$0xff]  ;;  %v52_v28 = vld [vmem:[%s661_s1 + $0x8] sm:$0xff]  ;;  %v54_v30 = vld [vmem:[%s661_s1 + $0x18] sm:$0xff] }
   0xe   :  { %v51_v26 = vld [vmem:[%s661_s1] sm:$0xff]  ;;  %v180_v43 = vld [vmem:[%s664_s4 + $0x18] sm:$0xff]  ;;  %v179_v49 = vld [vmem:[%s664_s4 + $0x10] sm:$0xff] }
   0xf   :  { %198 = vperm.xlu2 %419, %v180_v43   ;;  %v173_v48 = vld [vmem:[%s663_s3] sm:$0xff]  ;;  %v174_v50 = vld [vmem:[%s663_s3 + $0x8] sm:$0xff]  ;;  %v253_v51 = vld [vmem:[%s666_s6 + $0x18] sm:$0xff] }
  0x10   :  { %389 = vmatpush.xpose.msk.msra.mxu0 %vm79_vm0, %v47_v4  ;;  %71 = vperm.xlu0 %417, %v57_v13   ;;  %v175_v52 = vld [vmem:[%s663_s3 + $0x10] sm:$0xff]  ;;  %v250_v53 = vld [vmem:[%s666_s6] sm:$0xff]  ;;  %v176_v54 = vld [vmem:[%s663_s3 + $0x18] sm:$0xff] }
  0x11   :  { %61 = vperm.xlu1 %418, %v55_v16   ;;  %v247_v8 = vld [vmem:[%s665_s5 + $0x8] sm:$0xff]  ;;  %v249_v10 = vld [vmem:[%s665_s5 + $0x18] sm:$0xff] }
  0x14   :  { %390 = vmatpush.xpose.msk.msra.mxu0 %vm79_vm0, %v46_v5 }
  0x17   :  { %193 = vperm.xlu2 %419, %v179_v49  }
  0x18   :  { %391 = vmatpush.xpose.msk.msra.mxu0 %vm79_vm0, %v45_v6  ;;  %188 = vperm.xlu0 %417, %v178_v17  }
  0x19   :  { %183 = vperm.xlu1 %418, %v177_v23  }
  0x1c   :  { %392 = vmatpush.xpose.msk.msra.mxu0 %vm79_vm0, %v44_v7  ;;  %v246_v7 = vld [vmem:[%s665_s5] sm:$0xff] }
  0x1f   :  { %271 = vperm.xlu2 %419, %v253_v51  }
  0x20   :  { %393 = vmatpush.xpose.msk.msra.mxu0 %vm79_vm0, %v43_v9  ;;  %266 = vperm.xlu0 %417, %v252_v20   ;;  %v248_v9 = vld [vmem:[%s665_s5 + $0x10] sm:$0xff] }
  0x21   :  { %261 = vperm.xlu1 %418, %v251_v27   ;;  %v319_v27 = vld [vmem:[%s667_s7] sm:$0x1]  ;;  %s451_s7 = smov [#allocation3]  }
  0x22   :  { %s375_s17 = sshll.u32 %s451_s7, 4  ;;  %s376_s17 = int_to_ptr.vmem [resolvable:$true] %s375_s17 }
  0x24   :  { %394 = vmatpush.xpose.msk.msra.mxu0 %vm79_vm0, %v42_v11 }
  0x27   :  { %256 = vperm.xlu2 %419, %v250_v53  }
  0x28   :  { %395 = vmatpush.xpose.msk.msra.mxu0 %vm79_vm0, %v41_v14  ;;  %323 = vperm.xlu0 %417, %v320_v24  }
  0x2c   :  { %396 = vmatpush.xpose.msk.msra.mxu0 %vm79_vm0, %v40_v15 }
  0x30   :  { %397 = vmatpush.xpose.msk.msra.mxu0 %vm79_vm0, %v39_v18 }
  0x34   :  { %398 = vmatpush.xpose.msk.msra.mxu0 %vm79_vm0, %v38_v19 }
  0x38   :  { %399 = vmatpush.xpose.msk.msra.mxu0 %vm79_vm0, %v37_v21 }
  0x3c   :  { %400 = vmatpush.xpose.msk.msra.mxu0 %vm79_vm0, %v36_v22 }
  0x40   :  { %401 = vmatpush.xpose.msk.msra.mxu0 %vm79_vm0, %v35_v25 }
  0x43   :  { %402 = vmatmul.msk.f32.vlgmr.msra.gmra.mxu0 %vm79_vm0, %v51_v26 }
  0x4b   :  { %403 = vmatmul.msk.f32.gmra.mxu0 %vm79_vm0, %v52_v28 }
  0x53   :  { %404 = vmatmul.msk.f32.gmra.mxu0 %vm79_vm0, %v53_v29 }
  0x5b   :  { %405 = vmatmul.msk.f32.gmra.mxu0 %vm79_vm0, %v54_v30 }
  0x69   :  { %v199_v57 = vpop.permute.xlu2 %198 }
  0x71   :  { %v194_v59 = vpop.permute.xlu2 %193 }
  0x79   :  { %v272_v14 = vpop.permute.xlu2 %271 }
  0x7a   :  { %v77_v33 = vpop.permute.xlu0 %76 }
  0x7b   :  { %v67_v34 = vpop.permute.xlu1 %66 }
  0x81   :  { %v257_v22 = vpop.permute.xlu2 %256 }
  0x82   :  { %v72_v36 = vpop.permute.xlu0 %71 }
  0x83   :  { %v62_v40 = vpop.permute.xlu1 %61 }
  0x8a   :  { %v189_v63 = vpop.permute.xlu0 %188 }
  0x8b   :  { %v184_v2 = vpop.permute.xlu1 %183 }
  0x92   :  { %v267_v15 = vpop.permute.xlu0 %266 }
  0x93   :  { %v262_v19 = vpop.permute.xlu1 %261 }
  0x9a   :  { %v324_v28 = vpop.permute.xlu0 %323 }
  0x9b   :  { %v326_v29 = vperm.slane %v324_v28, 0 }
  0xc0   :  { %v157_v31 = vpop.f32.mrf.mxu0 }
  0xc1   :  { %v158_v44 = vadd.f32 %v157_v31, %v62_v40 }
  0xc3   :  { %v169_v47 = vmax.f32 %v158_v44, 0.0 }
  0xc8   :  { %v160_v32 = vpop.f32.mrf.mxu0 }
  0xc9   :  { %v161_v41 = vadd.f32 %v160_v32, %v67_v34 }
  0xcb   :  { %v170_v46 = vmax.f32 %v161_v41, 0.0 }
  0xd0   :  { %v163_v35 = vpop.f32.mrf.mxu0 }
  0xd1   :  { %v164_v38 = vadd.f32 %v163_v35, %v72_v36 }
  0xd3   :  { %v171_v45 = vmax.f32 %v164_v38, 0.0 }
  0xd8   :  { %v166_v37 = vpop.f32.mrf.mxu0 }
  0xd9   :  { %v167_v39 = vadd.f32 %v166_v37, %v77_v33 }
  0xdb   :  { %v172_v42 = vmax.f32 %v167_v39, 0.0 }
  0xdd   :  { %225 = vmatpush.msra.mxu1 %v172_v42 }
  0xdf   :  { %226 = vmatpush.msra.mxu1 %v171_v45 }
  0xe1   :  { %227 = vmatpush.msra.mxu1 %v170_v46 }
  0xe3   :  { %228 = vmatpush.msra.mxu1 %v169_v47 }
  0xe4   :  { %406 = vmatmul.msk.f32.vlgmr.msra.gmra.mxu1 %vm79_vm0, %v173_v48 }
  0xec   :  { %407 = vmatmul.msk.f32.gmra.mxu1 %vm79_vm0, %v174_v50 }
  0xf4   :  { %408 = vmatmul.msk.f32.gmra.mxu1 %vm79_vm0, %v175_v52 }
  0xfc   :  { %409 = vmatmul.msk.f32.gmra.mxu1 %vm79_vm0, %v176_v54 }
 0x161   :  { %v230_v55 = vpop.f32.mrf.mxu1 }
 0x162   :  { %v231_v3 = vadd.f32 %v230_v55, %v184_v2 }
 0x164   :  { %v242_v6 = vmax.f32 %v231_v3, 0.0 }
 0x169   :  { %v233_v56 = vpop.f32.mrf.mxu1 }
 0x16a   :  { %v234_v0 = vadd.f32 %v233_v56, %v189_v63 }
 0x16c   :  { %v243_v5 = vmax.f32 %v234_v0, 0.0 }
 0x171   :  { %v236_v58 = vpop.f32.mrf.mxu1 }
 0x172   :  { %v237_v61 = vadd.f32 %v236_v58, %v194_v59 }
 0x174   :  { %v244_v4 = vmax.f32 %v237_v61, 0.0 }
 0x179   :  { %v239_v60 = vpop.f32.mrf.mxu1 }
 0x17a   :  { %v240_v62 = vadd.f32 %v239_v60, %v199_v57 }
 0x17c   :  { %v245_v1 = vmax.f32 %v240_v62, 0.0 }
 0x17e   :  { %298 = vmatpush.msra.mxu2 %v245_v1 }
 0x180   :  { %299 = vmatpush.msra.mxu2 %v244_v4 }
 0x182   :  { %300 = vmatpush.msra.mxu2 %v243_v5 }
 0x184   :  { %301 = vmatpush.msra.mxu2 %v242_v6 }
 0x185   :  { %410 = vmatmul.msk.f32.vlgmr.msra.gmra.mxu2 %vm79_vm0, %v246_v7 }
 0x18d   :  { %411 = vmatmul.msk.f32.gmra.mxu2 %vm79_vm0, %v247_v8 }
 0x195   :  { %412 = vmatmul.msk.f32.gmra.mxu2 %vm79_vm0, %v248_v9 }
 0x19d   :  { %413 = vmatmul.msk.f32.gmra.mxu2 %vm79_vm0, %v249_v10 }
 0x208   :  { %v303_v11 = vpop.f32.mrf.mxu2 }
 0x209   :  { %v304_v23 = vadd.f32 %v303_v11, %v257_v22 }
 0x20b   :  { %v315_v26 = vmax.f32 %v304_v23, 0.0 }
 0x210   :  { %v306_v12 = vpop.f32.mrf.mxu2 }
 0x211   :  { %v307_v20 = vadd.f32 %v306_v12, %v262_v19 }
 0x213   :  { %v316_v25 = vmax.f32 %v307_v20, 0.0 }
 0x218   :  { %v309_v13 = vpop.f32.mrf.mxu2 }
 0x219   :  { %v310_v17 = vadd.f32 %v309_v13, %v267_v15 }
 0x21b   :  { %v317_v24 = vmax.f32 %v310_v17, 0.0 }
 0x220   :  { %v312_v16 = vpop.f32.mrf.mxu2 }
 0x221   :  { %v313_v18 = vadd.f32 %v312_v16, %v272_v14 }
 0x223   :  { %v318_v21 = vmax.f32 %v313_v18, 0.0 }
 0x225   :  { %342 = vmatpush.msra.mxu3 %v318_v21 }
 0x227   :  { %343 = vmatpush.msra.mxu3 %v317_v24 }
 0x229   :  { %344 = vmatpush.msra.mxu3 %v316_v25 }
 0x22b   :  { %345 = vmatpush.msra.mxu3 %v315_v26 }
 0x22c   :  { %414 = vmatmul.msk.f32.vlgmr.msra.gmra.mxu3 %vm79_vm0, %v319_v27 }
 0x2af   :  { %v347_v30 = vpop.f32.mrf.mxu3 }
 0x2b0   :  { %v348_v31 = vadd.f32 %v347_v30, %v326_v29 }
 0x2b2   :  { %v350_v32 = vsub.f32 0.0, %v348_v31 }
 0x2b4   :  { %v351_v33 = vmul.f32 1.442695, %v350_v32 }
 0x2b6   :  { %420 = vpow2.f32 %v351_v33 }
 0x2bc   :  { %v421_v34 = vpop.eup %420 }
 0x2bd   :  { %v353_v35 = vadd.f32 1.0, %v421_v34 }
 0x2bf   :  { %422 = vrcp.f32 %v353_v35  ;;  %v365_v39 = vand.u32 2147483648, %v353_v35  ;;  %v363_v41 = vand.u32 2147483647, %v353_v35  ;;  %vm359_vm2 = vweird.f32 %v353_v35 }
 0x2c1   :  { %v366_v43 = vor.u32 1.1754944e-38, %v365_v39  ;;  %vm364_vm4 = vcmp.eq.f32.partialorder %v363_v41, 8.507059e+37 }
 0x2c5   :  { %v423_v36 = vpop.eup %422 }
 0x2c6   :  { %v355_v37 = vmul.f32 %v423_v36, %v353_v35  ;;  %vm360_vm1 = vweird.f32 %v423_v36 }
 0x2c7   :  { %vm361_vm3 = vmor %vm359_vm2, %vm360_vm1 }
 0x2c8   :  { %v356_v38 = vsub.f32 1.0, %v355_v37 }
 0x2ca   :  { %v357_v40 = vmul.f32 %v423_v36, %v356_v38 }
 0x2cc   :  { %v358_v42 = vadd.f32 %v423_v36, %v357_v40 }
 0x2ce   :  { %v362_v44 = vsel %vm361_vm3, %v423_v36, %v358_v42 }
 0x2cf   :  { %v367_v45 = vsel %vm364_vm4, %v366_v43, %v362_v44 }
 0x2d0   :  { %369 = vst [vmem:[#allocation3] sm:$0x1] %v367_v45 }
 0x2d1   :  { %380 = dma.vmem_to_hbm [thread:$0]  %s376_s17, 16, %s378_s20, [#allocation4]  }
 0x2d2   :  { %448 = dma.done.wait [#allocation4], 16  }
 0x2d3   :  { %449 = vsyncadd [#allocation4], 4294967280 }
 0x2d4   :  { %385 = vsyncpa [#allocation4], 1 }

</bundles_post_ra>
